<compile_context>
chip_gen: v6e
topology: v6e:2x2x1
jax: 0.10.0
libtpu: 0.0.40
codegen_flags: <defaults>
</compile_context>

<pallas_src>
import functools

import jax
import jax.numpy as jnp
from jax.experimental import pallas as pl
from jax.experimental.pallas import tpu as pltpu

EPS = 1e-5


def _round_up(x, m):
    return (x + m - 1) // m * m


# ---------------------------------- Pallas kernel ----------------------------------
def patch_embed_kernel(p_ref, w_ref, b_ref, *rest, use_norm, inv_n):
    # p_ref : (TILE, K)   bf16 flattened patches (K = C*p*p)
    # w_ref : (K, E_pad)  bf16 reshaped conv weight (VMEM-resident across grid steps)
    # b_ref : (1, E_pad)  fp32 conv bias
    # rest  : (gamma, beta, out) if use_norm else (out,)
    y = jnp.dot(p_ref[...], w_ref[...], preferred_element_type=jnp.float32)
    y = y + b_ref[...]
    if use_norm:
        g_ref, beta_ref, o_ref = rest
        # Single-pass stats: one VPU pass + two XLU reductions.  Padded embed columns
        # are exactly zero (zero weight cols / zero bias), so summing over the padded
        # width and dividing by the true width (inv_n) is exact.
        s1 = jnp.sum(y, axis=-1, keepdims=True)
        s2 = jnp.sum(y * y, axis=-1, keepdims=True)
        mu = s1 * inv_n
        var = jnp.maximum(s2 * inv_n - mu * mu, 0.0)
        y = (y - mu) * jax.lax.rsqrt(var + EPS) * g_ref[...] + beta_ref[...]
    else:
        (o_ref,) = rest
    o_ref[...] = y.astype(o_ref.dtype)


# ------------------------------------- wrapper -------------------------------------
@functools.partial(jax.jit, static_argnames=("patch_size", "use_norm"))
def patch_embed(x, w, b, gamma=None, beta=None, *, patch_size, use_norm):
    """x: (B, C, H, W);  w: (E, C, p, p);  b/gamma/beta: (E,)  ->  (B, L, E) float32."""
    B, C, H, W = x.shape
    p = patch_size
    Hp, Wp = H // p, W // p
    L = Hp * Wp
    E = w.shape[0]
    K = C * p * p

    # bf16 cast BEFORE the patchify relayout (halves that HBM round-trip) and bf16
    # operands for the MXU; accumulation inside the kernel is fp32.
    xb = x.astype(jnp.bfloat16)
    patches = (xb.reshape(B, C, Hp, p, Wp, p)
                 .transpose(0, 2, 4, 1, 3, 5)            # Conv2d's (c, ph, pw) order
                 .reshape(B * L, K))
    w2d = w.reshape(E, K).T.astype(jnp.bfloat16)          # (K, E)
    b2d = b.reshape(1, E).astype(jnp.float32)

    # Lane-dense output: pad embed dim to a multiple of 128 (unmasked stores).
    E_pad = _round_up(E, 128)
    if E_pad != E:
        w2d = jnp.pad(w2d, ((0, 0), (0, E_pad - E)))
        b2d = jnp.pad(b2d, ((0, 0), (0, E_pad - E)))

    extra_in, extra_specs = [], []
    if use_norm:
        g2d = gamma.reshape(1, E).astype(jnp.float32)
        be2d = beta.reshape(1, E).astype(jnp.float32)
        if E_pad != E:
            g2d = jnp.pad(g2d, ((0, 0), (0, E_pad - E)))
            be2d = jnp.pad(be2d, ((0, 0), (0, E_pad - E)))
        extra_in = [g2d, be2d]
        extra_specs = [pl.BlockSpec((1, E_pad), lambda i: (0, 0)),
                       pl.BlockSpec((1, E_pad), lambda i: (0, 0))]

    # Rows padded to a multiple of 8 so every (TILE, .) block meets the (8, 128) rule.
    T = B * L
    T_pad = _round_up(T, 8)
    if T_pad != T:
        patches = jnp.pad(patches, ((0, T_pad - T), (0, 0)))

    # Big row tiles amortize the ~0.35us/step overhead (cap 2048 rows: <3 MiB
    # double-buffered, fine even in v7x's 64 MiB VMEM), but force >= 2 grid steps so
    # the "parallel" axis can actually use v7x's second TensorCore.
    half = _round_up(pl.cdiv(T_pad, 2), 8)
    TILE = max(8, min(2048, half))
    grid = (pl.cdiv(T_pad, TILE),)

    kernel = functools.partial(patch_embed_kernel, use_norm=use_norm, inv_n=1.0 / E)
    out = pl.pallas_call(
        kernel,
        out_shape=jax.ShapeDtypeStruct((T_pad, E_pad), jnp.float32),
        grid=grid,
        in_specs=[
            pl.BlockSpec((TILE, K), lambda i: (i, 0)),     # patches (row-tiled)
            pl.BlockSpec((K, E_pad), lambda i: (0, 0)),    # weight (VMEM-resident)
            pl.BlockSpec((1, E_pad), lambda i: (0, 0)),    # bias
            *extra_specs,                                  # gamma / beta (only if norm)
        ],
        out_specs=pl.BlockSpec((TILE, E_pad), lambda i: (i, 0)),
        compiler_params=pltpu.CompilerParams(
            dimension_semantics=("parallel",)),
    )(patches, w2d, b2d, *extra_in)

    return out[:T, :E].reshape(B, L, E)


# --------------------------- references (correctness checks) ---------------------------
def reference_forward(x, w, b, gamma, beta, *, patch_size, use_norm):
    """fp32 HIGHEST-precision conv reference == PyTorch module semantics."""
    hp = jax.lax.Precision.HIGHEST
    y = jax.lax.conv_general_dilated(
        x, w, window_strides=(patch_size, patch_size), padding='VALID',
        dimension_numbers=('NCHW', 'OIHW', 'NCHW'), precision=hp)
    y = y + b[None, :, None, None]
    B, E, Hp, Wp = y.shape
    y = y.reshape(B, E, Hp * Wp).transpose(0, 2, 1)        # (B, L, E)
    if use_norm:
        mu = jnp.mean(y, -1, keepdims=True)
        var = jnp.mean((y - mu) ** 2, -1, keepdims=True)
        y = (y - mu) / jnp.sqrt(var + EPS) * gamma + beta
    return y


def reference_bf16_mirror(x, w, b, gamma, beta, *, patch_size, use_norm):
    """Plain-JAX mirror of the kernel math (bf16 operands, fp32 accumulate/epilogue)."""
    B, C, H, W = x.shape
    p = patch_size
    Hp, Wp = H // p, W // p
    E = w.shape[0]
    K = C * p * p
    patches = (x.astype(jnp.bfloat16).reshape(B, C, Hp, p, Wp, p)
                 .transpose(0, 2, 4, 1, 3, 5).reshape(B * Hp * Wp, K))
    w2d = w.reshape(E, K).T.astype(jnp.bfloat16)
    y = jnp.dot(patches, w2d, preferred_element_type=jnp.float32) + b[None, :]
    if use_norm:
        mu = jnp.mean(y, -1, keepdims=True)
        var = jnp.maximum(jnp.mean(y * y, -1, keepdims=True) - mu * mu, 0.0)
        y = (y - mu) * jax.lax.rsqrt(var + EPS) * gamma + beta
    return y.reshape(B, Hp * Wp, E)


# ---------------------------------------- main ----------------------------------------
if __name__ == "__main__":
    key = jax.random.PRNGKey(0)

    # Small shapes consistent with the module: img_size=32, patch_size=4, in_chans=3.
    B, C, IMG, P = 2, 3, 32, 4
    L = (IMG // P) * (IMG // P)

    # E=96 is the Swin-T default and exercises the lane-padding (96 -> 128) path;
    # E=128 exercises the already-lane-dense path.  norm_layer=None and LayerNorm paths.
    for E, use_norm in ((96, False), (96, True), (128, True)):
        kx, kw, kb, kg, kbe = jax.random.split(
            jax.random.fold_in(key, 2 * E + int(use_norm)), 5)
        x = jax.random.normal(kx, (B, C, IMG, IMG), jnp.float32)
        w = 0.02 * jax.random.normal(kw, (E, C, P, P), jnp.float32)
        b = 0.01 * jax.random.normal(kb, (E,), jnp.float32)
        gamma = 1.0 + 0.1 * jax.random.normal(kg, (E,), jnp.float32)
        beta = 0.05 * jax.random.normal(kbe, (E,), jnp.float32)

        if use_norm:
            out = patch_embed(x, w, b, gamma, beta, patch_size=P, use_norm=True)
        else:
            out = patch_embed(x, w, b, patch_size=P, use_norm=False)
        out = jax.block_until_ready(out)
        assert out.shape == (B, L, E)
        assert bool(jnp.all(jnp.isfinite(out)))

        # (1) Exactness check vs a plain-JAX mirror of the kernel math (same bf16
        #     operands, fp32 accumulate) — verifies the Pallas kernel itself.
        mirror = reference_bf16_mirror(x, w, b, gamma, beta,
                                       patch_size=P, use_norm=use_norm)
        err_m = float(jnp.max(jnp.abs(out - mirror)))
        assert err_m < (1e-3 if use_norm else 1e-4), \
            f"mirror err {err_m} (E={E}, norm={use_norm})"

        # (2) Accuracy check vs the fp32 module semantics.  bf16 operand quantization
        #     gives ~1e-3 abs error on the pre-norm activations (scale ~0.14 with these
        #     0.02-scale weights); LayerNorm's 1/std rescaling amplifies it ~7x, hence
        #     the looser bound for the norm path.
        ref = reference_forward(x, w, b, gamma, beta,
                                patch_size=P, use_norm=use_norm)
        err = float(jnp.max(jnp.abs(out - ref)))
        tol = 3e-2 if use_norm else 3e-3
        assert err < tol, f"fp32-ref err {err} (E={E}, norm={use_norm})"

    print("KERNEL_OK")
</pallas_src>

<mosaic_0001>
module attributes {stable_mosaic.version = 11 : i64} {
  func.func @patch_embed_kernel(%arg0: i32, %arg1: memref<64x48xbf16, #tpu.memory_space<vmem>>, %arg2: memref<48x128xbf16, #tpu.memory_space<vmem>>, %arg3: memref<1x128xf32, #tpu.memory_space<vmem>>, %arg4: memref<64x128xf32, #tpu.memory_space<vmem>>) attributes {dimension_semantics = [#tpu.dimension_semantics<parallel>], iteration_bounds = array<i64: 2>, scalar_prefetch = 0 : i64, scratch_operands = 0 : i64, tpu.core_type = #tpu.core_type<tc>, window_params = [{transform_indices = @transform_0, window_bounds = array<i64: 64, 48>}, {pipeline_mode = #tpu.pipeline_mode<synchronous>, transform_indices = @transform_1, window_bounds = array<i64: 48, 128>}, {pipeline_mode = #tpu.pipeline_mode<synchronous>, transform_indices = @transform_2, window_bounds = array<i64: 1, 128>}, {transform_indices = @transform_3, window_bounds = array<i64: 64, 128>}]} {
    %c0 = arith.constant 0 : index
    %c0_0 = arith.constant 0 : index
    %0 = vector.load %arg1[%c0, %c0_0] : memref<64x48xbf16, #tpu.memory_space<vmem>>, vector<64x48xbf16>
    %c0_1 = arith.constant 0 : index
    %c0_2 = arith.constant 0 : index
    %1 = vector.load %arg2[%c0_1, %c0_2] : memref<48x128xbf16, #tpu.memory_space<vmem>>, vector<48x128xbf16>
    %cst = arith.constant dense<0.000000e+00> : vector<64x128xf32>
    %2 = tpu.matmul %0, %1, %cst {dimension_numbers = #tpu.dot_dimension_numbers<[1], [0], [0], [1], [0, 0, 1, 1], [], []>} : vector<64x48xbf16>, vector<48x128xbf16>, vector<64x128xf32> -> vector<64x128xf32>
    %c0_3 = arith.constant 0 : index
    %c0_4 = arith.constant 0 : index
    %3 = vector.load %arg3[%c0_3, %c0_4] : memref<1x128xf32, #tpu.memory_space<vmem>>, vector<1x128xf32>
    %4 = vector.broadcast %3 : vector<1x128xf32> to vector<64x128xf32>
    %5 = arith.addf %2, %4 : vector<64x128xf32>
    %c0_5 = arith.constant 0 : index
    %c0_6 = arith.constant 0 : index
    %6 = vector.load %arg4[%c0_5, %c0_6] : memref<64x128xf32, #tpu.memory_space<vmem>>, vector<64x128xf32>
    tpu.vector_store %arg4[%c0_5, %c0_6], %5 {strides = array<i32>} : memref<64x128xf32, #tpu.memory_space<vmem>>, vector<64x128xf32>,
    return
  }
  func.func @transform_0(%arg0: i32) -> (i32, i32) {
    %c0_i32 = arith.constant 0 : i32
    %c0_i32_0 = arith.constant 0 : i32
    return %arg0, %c0_i32 : i32, i32
  }
  func.func @transform_1(%arg0: i32) -> (i32, i32) {
    %c0_i32 = arith.constant 0 : i32
    %c0_i32_0 = arith.constant 0 : i32
    %c0_i32_1 = arith.constant 0 : i32
    return %c0_i32, %c0_i32_0 : i32, i32
  }
  func.func @transform_2(%arg0: i32) -> (i32, i32) {
    %c0_i32 = arith.constant 0 : i32
    %c0_i32_0 = arith.constant 0 : i32
    %c0_i32_1 = arith.constant 0 : i32
    return %c0_i32, %c0_i32_0 : i32, i32
  }
  func.func @transform_3(%arg0: i32) -> (i32, i32) {
    %c0_i32 = arith.constant 0 : i32
    %c0_i32_0 = arith.constant 0 : i32
    return %arg0, %c0_i32 : i32, i32
  }
}

</mosaic_0001>

<bundles_post_ra>
// kernel: patch_embed.1
= control target key start
LH: loop header
LB: loop body
LE: loop exit
PB: predicated region body
PF: predicated region fallthrough
CT: control target
= control target key end

     0   :  { %8 = vsyncpa [#allocation3], 0  ;;  %s696_s0 = inlined_call_operand.vmem [shape: bf16[128,48], index: 0, kind: input, shape index: {}]   ;;  %s697_s1 = inlined_call_operand.vmem [shape: bf16[48,128], index: 1, kind: input, shape index: {}]   ;;  %s698_s2 = inlined_call_operand.vmem [shape: f32[1,128], index: 2, kind: input, shape index: {}]   ;;  %s699_s3 = inlined_call_operand.hbm [shape: f32[128,128], index: 3, kind: output, shape index: {}]  }
   0x1   :  { %10 = vsyncpa [#allocation3 + $0x1], 0  ;;  %s579_s12 = smov 0   ;;  %s581_s13 = smov 0  }
   0x2   :  { %s583_s14 = smov 0   ;;  %s585_s15 = smov 0  }
   0x3 LB: > { %s600_s16 = sadd.s32 4294967295, %s554_s15   ;;  %s394_s17 = sadd.s32 4294967294, %s554_s15   ;;  %s554_s15 = sphi %s585_s15, %s705_s15   ;;  %s550_s14 = sphi %s583_s14, %s704_s14   ;;  %s546_s13 = sphi %s581_s13, %s703_s13   ;;  %s542_s12 = sphi %s579_s12, %s702_s12  }
   0x4   : > { %s604_s18 = sadd.s32 1, %s554_s15   ;;  %s91_s19 = sadd.s32 1, %s550_s14 }
   0x5   : > { %s88_s20 = ssub.s32 %s554_s15, %s604_s18  ;;  %p101_p0 = scmp.ne.s32.totalorder %s550_s14, %s546_s13 }
   0x6   : > { %p89_p1 = scmp.eq.s32.totalorder %s88_s20, 0  ;;  %p102_p2 = scmp.eq.s32.totalorder %s600_s16, 1 }
   0x7   : > { %p107_p3 = scmp.ne.s32.totalorder %s546_s13, %s542_s12  ;;  %p108_p4 = scmp.eq.s32.totalorder %s394_s17, 1 }
   0x8   : > { %s615_s21 = scalar_select %p89_p1, %s550_s14, %s91_s19  }
   0x9   : > { %p617_p5 = por %p102_p2, %p101_p0  ;;  %p621_p6 = por %p108_p4, %p107_p3 }
   0xa   : > { %p397_p7 = scmp.ge.s32.totalorder %s554_s15, 1  ;;  %p141_p8 = scmp.lt.s32.totalorder %s554_s15, 3 }
   0xc   : > { %p142_p9 = pnand %p397_p7, %p141_p8 }
   0xd   : > { %s399_s26 = sshll.u32 (!%p142_p9), %s600_s16, 3  ;;  %s162_s8 = sand.u32 (!%p142_p9), 1, %s546_s13  }
   0xe   : > { %145 = sbr.rel (%p142_p9) target bundleno = 247 (0xf7), region = 32  ;;  %p166_p10 = scmp.lt.s32.totalorder (!%p142_p9), %s399_s26, 15 }
   0xf   : > { %s398_s9 = sshll.u32 (!%p142_p9), %s162_s8, 6  ;;  %s418_s19 = sshll.u32 (!%p142_p9), %s600_s16, 10 }
  0x10   : > { %s164_s17 = scalar_lea.vmem (!%p142_p9), [#allocation2], %s398_s9  ;;  %s656_s16 = scalar_lea.sflag (!%p142_p9), [#allocation3], %s162_s8 }
  0x11   : > { %s332_s20 = sshll.u32 (!%p142_p9), %s164_s17, 4  ;;  %s556_s28 = smov (!%p142_p9), [#allocation2]   ;;  %s652_s20 = int_to_ptr.vmem [resolvable:$true] %s332_s20 }
  0x12   : > { %s494_s27 = scalar_lea.vmem (!%p142_p9), %s652_s20, 1024  ;;  %s498_s29 = sshll.u32 (!%p142_p9), %s556_s28, 4  ;;  %s499_s29 = int_to_ptr.vmem [resolvable:$false] %s498_s29 }
  0x13   : > { %v487_v0 = vld [vmem:[%s697_s1 + $0x10] sm:$0xff]   ;;  %v488_v1 = vld [vmem:[%s697_s1 + $0x8] sm:$0xff]   ;;  %s707_s26 = smov (!%p166_p10, %s399_s26), 15  ;;  %v489_v2 = vld [vmem:[%s697_s1] sm:$0xff]   ;;  %vm232_vm0 = vcmask 392192   ;;  %p495_p11 = scmp.ne.s32.totalorder %s652_s20, %s494_s27 }
  0x14   : > { %426 = vmatprep.subr.bf16.mxu0 %v487_v0  ;;  %440 = vmatprep.subr.bf16.mxu1 %v487_v0  ;;  %s400_s4 = sshll.u32 %s707_s26, 2  ;;  %v401_v7 = vld [vmem:[%s698_s2] ss:$0 sm:$0xff]  ;;  %s650_s26 = scalar_lea.hbm %s699_s3, %s418_s19 }
  0x15   : > { %427 = vmatpush3.bf16.msra.mxu0 %v487_v0  ;;  %443 = vmatpush3.bf16.msra.mxu1 %v487_v0  ;;  %s169_s7 = scalar_lea.vmem %s696_s0, %s400_s4  ;;  %p496_p12 = pnand %p495_p11, %p617_p5 }
  0x16   : > { %428 = vmatprep.subr.bf16.mxu0 %v488_v1  ;;  %441 = vmatprep.subr.bf16.mxu1 %v488_v1  ;;  %v490_v3 = vld [vmem:[%s169_s7] sm:$0xff]   ;;  %v491_v4 = vld [vmem:[%s169_s7 + $0x10] sm:$0xff]   ;;  %v492_v5 = vld [vmem:[%s169_s7 + $0x8] sm:$0xff]   ;;  %s500_s30 = scalar_lea.vmem %s499_s29, 2048  ;;  %p501_p0 = scmp.lt.s32.totalorder %s652_s20, %s499_s29 }
  0x17   : > { %432 = vmatprep.mubr.msk.bf16.mxu0 %vm232_vm0, %v490_v3  ;;  %436 = vmatprep.mubr.msk.bf16.mxu1 %vm232_vm0, %v491_v4  ;;  %v493_v6 = vld [vmem:[%s169_s7 + $0x18] sm:$0xff]   ;;  %p497_p13 = pneg %p496_p12  ;;  %p502_p1 = scmp.lt.s32.totalorder %s500_s30, %s494_s27 }
  0x19   : > { %429 = vmatpush3.bf16.msra.mxu0 %v488_v1  ;;  %444 = vmatpush3.bf16.msra.mxu1 %v488_v1  ;;  %p503_p2 = por %p502_p1, %p501_p0 }
  0x1a   : > { %430 = vmatprep.subr.bf16.mxu0 %v489_v2  ;;  %442 = vmatprep.subr.bf16.mxu1 %v489_v2 }
  0x1b   : > { %p504_p3 = pnand %p503_p2, %p497_p13 }
  0x1d   : > { %431 = vmatpush3.bf16.msra.mxu0 %v489_v2  ;;  %445 = vmatpush3.bf16.msra.mxu1 %v489_v2 }
  0x20   : > { %433 = vmatmul.mubr.msk.bf16.vlgmr.msra.gmra.mxu0 %vm232_vm0, %v492_v5  ;;  %437 = vmatmul.mubr.msk.bf16.vlgmr.msra.gmra.mxu1 %vm232_vm0, %v493_v6 }
  0xe0   : > { %v434_v8 = vpop.f32.mrf.mxu0  ;;  %v438_v9 = vpop.f32.mrf.mxu1 }
  0xe1   : > { %v288_v10 = vadd.f32 %v434_v8, %v401_v7  ;;  %v304_v11 = vadd.f32 %v438_v9, %v401_v7 }
  0xe2   : > { %v279_v12 = vpop.f32.mrf.mxu0  ;;  %v295_v13 = vpop.f32.mrf.mxu1 }
  0xe3   : > { %312 = vst [vmem:[%s164_s17 + $0x10] sm:$0xff] %v288_v10  ;;  %316 = vst [vmem:[%s164_s17 + $0x30] sm:$0xff] %v304_v11  ;;  %v280_v14 = vadd.f32 %v401_v7, %v279_v12  ;;  %v296_v15 = vadd.f32 %v401_v7, %v295_v13 }
  0xe4   : > { %v435_v16 = vpop.f32.mrf.mxu0  ;;  %v439_v17 = vpop.f32.mrf.mxu1 }
  0xe5   : > { %310 = vst [vmem:[%s164_s17] sm:$0xff] %v280_v14  ;;  %314 = vst [vmem:[%s164_s17 + $0x20] sm:$0xff] %v296_v15  ;;  %v291_v18 = vadd.f32 %v435_v16, %v401_v7  ;;  %v307_v19 = vadd.f32 %v439_v17, %v401_v7 }
  0xe6   : > { %v282_v20 = vpop.f32.mrf.mxu0  ;;  %v298_v21 = vpop.f32.mrf.mxu1 }
  0xe7   : > { %313 = vst [vmem:[%s164_s17 + $0x18] sm:$0xff] %v291_v18  ;;  %317 = vst [vmem:[%s164_s17 + $0x38] sm:$0xff] %v307_v19  ;;  %v283_v22 = vadd.f32 %v401_v7, %v282_v20  ;;  %v299_v23 = vadd.f32 %v401_v7, %v298_v21 }
  0xe9   : > { %311 = vst [vmem:[%s164_s17 + $0x8] sm:$0xff] %v283_v22  ;;  %315 = vst [vmem:[%s164_s17 + $0x28] sm:$0xff] %v299_v23 }
  0xea   : > { %507 = shalt.err (!%p504_p3)
}
  0xeb   : > { %s508_s4 = scalar_lea.hbm %s650_s26, 1024  ;;  %s512_s7 = scalar_lea.hbm %s699_s3, 2048 }
  0xec   : > { %p509_p4 = scmp.ne.s32.totalorder %s650_s26, %s508_s4  ;;  %p513_p9 = scmp.lt.s32.totalorder %s650_s26, %s699_s3 }
  0xed   : > { %p514_p10 = scmp.lt.s32.totalorder %s512_s7, %s508_s4 }
  0xee   : > { %p510_p7 = pnand %p509_p4, %p617_p5 }
  0xef   : > { %p515_p11 = por %p514_p10, %p513_p9 }
  0xf0   : > { %p511_p8 = pneg %p510_p7 }
  0xf2   : > { %p516_p12 = pnand %p515_p11, %p511_p8 }
  0xf4   : > { %519 = shalt.err (!%p516_p12)
}
  0xf5   : > { %s557_s10 = smov 128   ;;  %s558_s11 = smov 8  }
  0xf6   : > { %446 = dma.vmem_to_hbm [thread:$0]  (%p617_p5), %s652_s20, 1024, %s650_s26, %s656_s16, %s557_s10, %s557_s10, %s558_s11  }
  0xf7 PF: > { %p452_p13 = scmp.ge.s32.totalorder %s554_s15, 2  ;;  %s347_s17 = sand.u32 1, %s542_s12  }
  0xf8   : > { %s348_s19 = scalar_lea.sflag [#allocation3], %s347_s17 }
  0xf9   : > { %p449_p0 = pnand %p452_p13, %p621_p6 }
  0xfb   : > { %p450_p1 = pneg %p449_p0 }
  0xfd   : > { %537 = dma.done.wait (%p450_p1), %s348_s19, 1024  }
  0xfe   : > { %539 = vsyncadd (%p450_p1), %s348_s19, 4294966272  ;;  %p13_p2 = scmp.ge.s32.totalorder %s604_s18, 4   ;;  %s702_s12 = smov %s546_s13 }
  0xff   : > { %s703_s13 = smov %s550_s14  ;;  %s704_s14 = smov %s615_s21 }
 0x100   : > { %s705_s15 = smov %s604_s18  ;;  %15 = sbr.rel (!%p13_p2) target bundleno = 3 (0x3), region = 67 }
 0x105   :  { %353 = vsyncpa [#allocation3], 1 }
 0x106   :  { %355 = vsyncpa [#allocation3 + $0x1], 1 }

</bundles_post_ra>
